<compile_context>
chip_gen: v6e
topology: v6e:2x2x1
jax: 0.10.0
libtpu: 0.0.40
codegen_flags: <defaults>
</compile_context>

<pallas_src>
import functools

import jax
import jax.numpy as jnp
from jax.experimental import pallas as pl
from jax.experimental.pallas import tpu as pltpu


def _round_up(x, m):
    return ((x + m - 1) // m) * m


def _attention_kernel(x_ref, halo_ref, wblk_ref, pblk_ref, eblk_ref, o_ref, *,
                      attn_width, tile_t):
    """One grid step == `tile_t` consecutive output timesteps.

    All refs are lane-dense 2-D slabs with the (batch*hidden) axis on lanes:
      x_ref    : (tile_t, B*H)   this tile's timesteps
      halo_ref : (1, w, B*H)     the w timesteps preceding this tile (zeros for tile 0)
      wblk_ref : (B*H, B*H)      block-diag(weight_W)   -> per-batch x@W in one matmul
      pblk_ref : (B*H, B)        block-diag(weight_proj)-> per-(time,batch) logits
      eblk_ref : (B, B*H)        block "expand" matrix  -> broadcast a over the H lanes
      o_ref    : (tile_t, B*H)
    """
    w = attn_width
    x = x_ref[...]
    # halo-extended tile, assembled at the value level (no scratch round-trip)
    xe = jnp.concatenate([halo_ref[0], x], axis=0)                       # (N, B*H), N = tile_t + w

    # ---- per-row attention pipeline (hoisted: every source row computed exactly once)
    u = jnp.tanh(jnp.dot(xe, wblk_ref[...],
                         preferred_element_type=jnp.float32))            # (N, B*H)
    logits = jnp.dot(u, pblk_ref[...],
                     preferred_element_type=jnp.float32)                 # (N, B)

    # softmax over the BATCH axis (nn.Softmax() no-dim on 2-D tensor == dim=1),
    # exact division for bit-close parity with the PyTorch module.
    m = jnp.max(logits, axis=-1, keepdims=True)
    e = jnp.exp(logits - m)
    a = e / jnp.sum(e, axis=-1, keepdims=True)                           # (N, B)

    # weighted rows: a broadcast over each batch group's H lanes via a tiny matmul
    g = jnp.dot(a, eblk_ref[...], preferred_element_type=jnp.float32) * xe   # (N, B*H)

    # out[t] = g[t] + ... + g[t+w-1]   (ext-row indexing).  w is small, so an unrolled
    # shift-add chain; for large attention_width switch to a cumsum-difference.
    acc = g[0:tile_t]
    for j in range(1, w):
        acc = acc + g[j:j + tile_t]

    # first w timesteps of the whole sequence are a pass-through copy of the input
    t_idx = jax.lax.broadcasted_iota(jnp.int32, (tile_t, 1), 0)
    copy = jnp.logical_and(pl.program_id(0) == 0, t_idx < w)
    o_ref[...] = jnp.where(copy, x, acc).astype(o_ref.dtype)


def attention_layer(inputs, weight_W, weight_proj, attention_width=3, tile_t=None):
    """Pallas TPU implementation of AttentionLayer.forward."""
    T, B, H = inputs.shape
    assert weight_W.shape == (H, H) and weight_proj.shape == (H, 1)
    w = int(attention_width)

    if T <= w:
        # every timestep hits the pass-through branch of the module
        return inputs

    BH = B * H
    dt = inputs.dtype
    dt_bytes = jnp.dtype(dt).itemsize

    # ---- tile size: large tiles amortize the ~0.35 us/step overhead; bounded by VMEM
    if tile_t is None:
        tile_t = 512
    vmem_budget = 40 * 1024 * 1024                  # conservative for v7x (64 MiB physical)
    per_row = 16 * BH * dt_bytes                    # I/O double-buffers + live temporaries
    max_tile = max(8, (vmem_budget // per_row) // 8 * 8)
    tile_t = int(min(_round_up(int(tile_t), 8), _round_up(T, 8), max_tile))
    tile_t = max(tile_t, _round_up(w, 8), 8)        # multiple of 8, and >= attention_width

    n_t = pl.cdiv(T, tile_t)
    t_pad = n_t * tile_t

    # ---- lane-dense layout: (batch*hidden) on lanes; pad the time axis to the grid
    x2 = inputs.reshape(T, BH)
    if t_pad != T:
        x2 = jnp.pad(x2, ((0, t_pad - T), (0, 0)))

    # per-tile halo = the w timesteps preceding the tile (zeros for tile 0): only w
    # rows per tile are DMA'd instead of re-reading the whole previous tile.
    xz = jnp.concatenate([jnp.zeros((w, BH), dt), x2[:t_pad - w]], axis=0)
    halo = xz.reshape(n_t, tile_t, BH)[:, :w]                            # (n_t, w, BH)

    # block-diagonal weights: one lane-dense MXU matmul applies W per batch column group
    eye_b = jnp.eye(B, dtype=jnp.float32)
    w_blk = jnp.kron(eye_b, weight_W.astype(jnp.float32))                # (BH, BH)
    p_blk = jnp.kron(eye_b, weight_proj.astype(jnp.float32))             # (BH, B)
    e_blk = jnp.kron(eye_b, jnp.ones((1, H), jnp.float32))               # (B, BH)

    # ---- shape-derived VMEM limit (instead of a hard-coded 32 MiB)
    tile_io = tile_t * BH * dt_bytes
    est = (4 * tile_io                              # in + out, double-buffered
           + 2 * w * BH * dt_bytes                  # halo, double-buffered
           + 2 * (BH * BH + 2 * B * BH) * 4         # block weights
           + 8 * (tile_t + w) * BH * 4)             # live temporaries (xe / u / g / acc)
    vmem_limit = int(min(max(2 * est, 8 << 20), 64 << 20))

    kernel = functools.partial(_attention_kernel, attn_width=w, tile_t=tile_t)

    out = pl.pallas_call(
        kernel,
        out_shape=jax.ShapeDtypeStruct((t_pad, BH), dt),
        grid_spec=pltpu.PrefetchScalarGridSpec(
            num_scalar_prefetch=0,
            grid=(n_t,),
            in_specs=[
                pl.BlockSpec((tile_t, BH), lambda i: (i, 0)),        # tile of timesteps
                pl.BlockSpec((1, w, BH), lambda i: (i, 0, 0)),       # w-row halo
                pl.BlockSpec((BH, BH), lambda i: (0, 0)),            # block-diag W
                pl.BlockSpec((BH, B), lambda i: (0, 0)),             # block-diag proj
                pl.BlockSpec((B, BH), lambda i: (0, 0)),             # block expand
            ],
            out_specs=pl.BlockSpec((tile_t, BH), lambda i: (i, 0)),
        ),
        compiler_params=pltpu.CompilerParams(
            dimension_semantics=("parallel",),       # tiles independent -> both v7x TCs
            vmem_limit_bytes=vmem_limit,
        ),
    )(x2, halo, w_blk, p_blk, e_blk)

    return out[:T].reshape(T, B, H)


def attention_layer_ref(inputs, weight_W, weight_proj, attention_width=3):
    """Pure-JAX reference mirroring the PyTorch forward."""
    T, B, H = inputs.shape
    outs = []
    for i in range(T):
        if i < attention_width:
            outs.append(inputs[i])
        else:
            vec = inputs[i - attention_width:i]                               # (w, B, H)
            u = jnp.tanh(jnp.einsum("wbh,hk->wbk", vec, weight_W))
            logits = jnp.sum(u * weight_proj[:, 0][None, None, :], axis=-1)   # (w, B)
            a = jax.nn.softmax(logits, axis=1)                                # dim=1, nn.Softmax()
            outs.append(jnp.sum(a[:, :, None] * vec, axis=0))
    return jnp.stack(outs, axis=0)


if __name__ == "__main__":
    T, B, H = 8, 4, 32   # seq=8, batch=4, nhid=32  ->  B*H = 128 lanes (lane-dense)

    key = jax.random.PRNGKey(0)
    k_x1, k_x2, k_w, k_p = jax.random.split(key, 4)

    inputs = jax.random.normal(k_x1, (T, B, H), dtype=jnp.float32)
    # weight_W.data.uniform_(-0.1, 0.1); weight_proj.data.uniform_(-0.1, 0.1)
    weight_W = jax.random.uniform(k_w, (H, H), jnp.float32, minval=-0.1, maxval=0.1)
    weight_proj = jax.random.uniform(k_p, (H, 1), jnp.float32, minval=-0.1, maxval=0.1)

    TOL = 1e-4  # exact softmax now; slack only for f32 summation-order differences

    # 1) single-tile case
    out = attention_layer(inputs, weight_W, weight_proj, attention_width=3)
    out = jax.block_until_ready(out)
    ref = attention_layer_ref(inputs, weight_W, weight_proj, attention_width=3)
    assert out.shape == (T, B, H)
    assert jnp.allclose(out, ref, atol=TOL, rtol=TOL), float(jnp.max(jnp.abs(out - ref)))

    # 2) multi-tile case: cross-tile halo + tail padding (T=20, tile_t=8 -> 3 tiles)
    T2 = 20
    inputs2 = jax.random.normal(k_x2, (T2, B, H), dtype=jnp.float32)
    out2 = attention_layer(inputs2, weight_W, weight_proj, attention_width=3, tile_t=8)
    out2 = jax.block_until_ready(out2)
    ref2 = attention_layer_ref(inputs2, weight_W, weight_proj, attention_width=3)
    assert out2.shape == (T2, B, H)
    assert jnp.allclose(out2, ref2, atol=TOL, rtol=TOL), float(jnp.max(jnp.abs(out2 - ref2)))

    print("KERNEL_OK")
</pallas_src>

<mosaic_0001>
module attributes {stable_mosaic.version = 11 : i64} {
  func.func @_attention_kernel(%arg0: i32, %arg1: memref<8x128xf32, #tpu.memory_space<vmem>>, %arg2: memref<1x3x128xf32, #tpu.memory_space<vmem>>, %arg3: memref<128x128xf32, #tpu.memory_space<vmem>>, %arg4: memref<128x4xf32, #tpu.memory_space<vmem>>, %arg5: memref<4x128xf32, #tpu.memory_space<vmem>>, %arg6: memref<8x128xf32, #tpu.memory_space<vmem>>) attributes {dimension_semantics = [#tpu.dimension_semantics<parallel>], iteration_bounds = array<i64: 1>, scalar_prefetch = 0 : i64, scratch_operands = 0 : i64, tpu.core_type = #tpu.core_type<tc>, window_params = [{transform_indices = @transform_0, window_bounds = array<i64: 8, 128>}, {transform_indices = @transform_1, window_bounds = array<i64: 1, 3, 128>}, {pipeline_mode = #tpu.pipeline_mode<synchronous>, transform_indices = @transform_2, window_bounds = array<i64: 128, 128>}, {pipeline_mode = #tpu.pipeline_mode<synchronous>, transform_indices = @transform_3, window_bounds = array<i64: 128, 4>}, {pipeline_mode = #tpu.pipeline_mode<synchronous>, transform_indices = @transform_4, window_bounds = array<i64: 4, 128>}, {transform_indices = @transform_5, window_bounds = array<i64: 8, 128>}]} {
    %c0 = arith.constant 0 : index
    %c0_0 = arith.constant 0 : index
    %0 = vector.load %arg1[%c0, %c0_0] : memref<8x128xf32, #tpu.memory_space<vmem>>, vector<8x128xf32>
    %c0_1 = arith.constant 0 : index
    %c0_2 = arith.constant 0 : index
    %c0_3 = arith.constant 0 : index
    %1 = vector.load %arg2[%c0_1, %c0_2, %c0_3] : memref<1x3x128xf32, #tpu.memory_space<vmem>>, vector<1x3x128xf32>
    %2 = vector.shape_cast %1 : vector<1x3x128xf32> to vector<3x128xf32>
    %3 = tpu.concatenate %2, %0 in 0 : vector<3x128xf32>, vector<8x128xf32> -> vector<11x128xf32>
    %c0_4 = arith.constant 0 : index
    %c0_5 = arith.constant 0 : index
    %4 = vector.load %arg3[%c0_4, %c0_5] : memref<128x128xf32, #tpu.memory_space<vmem>>, vector<128x128xf32>
    %cst = arith.constant dense<0.000000e+00> : vector<11x128xf32>
    %5 = tpu.matmul %3, %4, %cst {dimension_numbers = #tpu.dot_dimension_numbers<[1], [0], [0], [1], [0, 0, 1, 1], [], []>} : vector<11x128xf32>, vector<128x128xf32>, vector<11x128xf32> -> vector<11x128xf32>
    %6 = math.tanh %5 : vector<11x128xf32>
    %c0_6 = arith.constant 0 : index
    %c0_7 = arith.constant 0 : index
    %7 = vector.load %arg4[%c0_6, %c0_7] : memref<128x4xf32, #tpu.memory_space<vmem>>, vector<128x4xf32>
    %cst_8 = arith.constant dense<0.000000e+00> : vector<11x4xf32>
    %8 = tpu.matmul %6, %7, %cst_8 {dimension_numbers = #tpu.dot_dimension_numbers<[1], [0], [0], [1], [0, 0, 1, 1], [], []>} : vector<11x128xf32>, vector<128x4xf32>, vector<11x4xf32> -> vector<11x4xf32>
    %cst_9 = arith.constant dense<0xFF800000> : vector<11xf32>
    %9 = vector.multi_reduction <maximumf>, %8, %cst_9 [1] : vector<11x4xf32> to vector<11xf32>
    %10 = vector.shape_cast %9 : vector<11xf32> to vector<11x1xf32>
    %11 = vector.broadcast %10 : vector<11x1xf32> to vector<11x4xf32>
    %12 = arith.subf %8, %11 : vector<11x4xf32>
    %13 = math.exp %12 : vector<11x4xf32>
    %cst_10 = arith.constant dense<0.000000e+00> : vector<11xf32>
    %14 = vector.multi_reduction <add>, %13, %cst_10 [1] : vector<11x4xf32> to vector<11xf32>
    %15 = vector.shape_cast %14 : vector<11xf32> to vector<11x1xf32>
    %16 = vector.broadcast %15 : vector<11x1xf32> to vector<11x4xf32>
    %17 = arith.divf %13, %16 : vector<11x4xf32>
    %c0_11 = arith.constant 0 : index
    %c0_12 = arith.constant 0 : index
    %18 = vector.load %arg5[%c0_11, %c0_12] : memref<4x128xf32, #tpu.memory_space<vmem>>, vector<4x128xf32>
    %cst_13 = arith.constant dense<0.000000e+00> : vector<11x128xf32>
    %19 = tpu.matmul %17, %18, %cst_13 {dimension_numbers = #tpu.dot_dimension_numbers<[1], [0], [0], [1], [0, 0, 1, 1], [], []>} : vector<11x4xf32>, vector<4x128xf32>, vector<11x128xf32> -> vector<11x128xf32>
    %20 = arith.mulf %19, %3 : vector<11x128xf32>
    %21 = vector.extract_strided_slice %20 {offsets = [0, 0], sizes = [8, 128], strides = [1, 1]} : vector<11x128xf32> to vector<8x128xf32>
    %22 = vector.extract_strided_slice %20 {offsets = [1, 0], sizes = [8, 128], strides = [1, 1]} : vector<11x128xf32> to vector<8x128xf32>
    %23 = arith.addf %21, %22 : vector<8x128xf32>
    %24 = vector.extract_strided_slice %20 {offsets = [2, 0], sizes = [8, 128], strides = [1, 1]} : vector<11x128xf32> to vector<8x128xf32>
    %25 = arith.addf %23, %24 : vector<8x128xf32>
    %26 = tpu.iota {dimensions = array<i32: 0>} : vector<8x1xi32>
    %c0_i32 = arith.constant 0 : i32
    %27 = arith.cmpi eq, %arg0, %c0_i32 : i32
    %c3_i32 = arith.constant 3 : i32
    %28 = vector.broadcast %c3_i32 : i32 to vector<8x1xi32>
    %29 = arith.cmpi slt, %26, %28 : vector<8x1xi32>
    %30 = vector.broadcast %27 : i1 to vector<8x1xi1>
    %31 = arith.andi %30, %29 : vector<8x1xi1>
    %32 = vector.shape_cast %31 : vector<8x1xi1> to vector<8x1xi1>
    %33 = vector.broadcast %32 : vector<8x1xi1> to vector<8x128xi1>
    %34 = arith.select %33, %0, %25 : vector<8x128xi1>, vector<8x128xf32>
    %c0_14 = arith.constant 0 : index
    %c0_15 = arith.constant 0 : index
    %35 = vector.load %arg6[%c0_14, %c0_15] : memref<8x128xf32, #tpu.memory_space<vmem>>, vector<8x128xf32>
    tpu.vector_store %arg6[%c0_14, %c0_15], %34 {strides = array<i32>} : memref<8x128xf32, #tpu.memory_space<vmem>>, vector<8x128xf32>,
    return
  }
  func.func @transform_0(%arg0: i32) -> (i32, i32) {
    %c0_i32 = arith.constant 0 : i32
    %c0_i32_0 = arith.constant 0 : i32
    return %arg0, %c0_i32 : i32, i32
  }
  func.func @transform_1(%arg0: i32) -> (i32, i32, i32) {
    %c0_i32 = arith.constant 0 : i32
    %c0_i32_0 = arith.constant 0 : i32
    %c0_i32_1 = arith.constant 0 : i32
    return %arg0, %c0_i32, %c0_i32_0 : i32, i32, i32
  }
  func.func @transform_2(%arg0: i32) -> (i32, i32) {
    %c0_i32 = arith.constant 0 : i32
    %c0_i32_0 = arith.constant 0 : i32
    %c0_i32_1 = arith.constant 0 : i32
    return %c0_i32, %c0_i32_0 : i32, i32
  }
  func.func @transform_3(%arg0: i32) -> (i32, i32) {
    %c0_i32 = arith.constant 0 : i32
    %c0_i32_0 = arith.constant 0 : i32
    %c0_i32_1 = arith.constant 0 : i32
    return %c0_i32, %c0_i32_0 : i32, i32
  }
  func.func @transform_4(%arg0: i32) -> (i32, i32) {
    %c0_i32 = arith.constant 0 : i32
    %c0_i32_0 = arith.constant 0 : i32
    %c0_i32_1 = arith.constant 0 : i32
    return %c0_i32, %c0_i32_0 : i32, i32
  }
  func.func @transform_5(%arg0: i32) -> (i32, i32) {
    %c0_i32 = arith.constant 0 : i32
    %c0_i32_0 = arith.constant 0 : i32
    return %arg0, %c0_i32 : i32, i32
  }
}

</mosaic_0001>

<bundles_post_ra>
// kernel: tpu_custom_call.1
= control target key start
LH: loop header
LB: loop body
LE: loop exit
PB: predicated region body
PF: predicated region fallthrough
CT: control target
= control target key end

     0   :  { %vm26_vm0 = vcmask 1042432   ;;  %s672_s0 = inlined_call_operand.vmem [shape: f32[8,128], index: 0, kind: input, shape index: {}]   ;;  %s673_s1 = inlined_call_operand.vmem [shape: f32[1,3,128], index: 1, kind: input, shape index: {}]   ;;  %s674_s2 = inlined_call_operand.vmem [shape: f32[128,128], index: 2, kind: input, shape index: {}]   ;;  %s675_s3 = inlined_call_operand.vmem [shape: f32[128,4], index: 3, kind: input, shape index: {}]   ;;  %s676_s4 = inlined_call_operand.vmem [shape: f32[4,128], index: 4, kind: input, shape index: {}]   ;;  %s677_s5 = inlined_call_operand.hbm [shape: f32[8,128], index: 5, kind: output, shape index: {}]  }
   0x1   :  { %v43_v0 = vld [vmem:[%s674_s2 + $0x78] sm:$0xff]  ;;  %v42_v1 = vld [vmem:[%s674_s2 + $0x70] sm:$0xff]  ;;  %v41_v2 = vld [vmem:[%s674_s2 + $0x68] sm:$0xff] }
   0x2   :  { %406 = vmatprep.subr.mxu0 %v43_v0  ;;  %v40_v3 = vld [vmem:[%s674_s2 + $0x60] sm:$0xff]  ;;  %v39_v6 = vld [vmem:[%s674_s2 + $0x58] sm:$0xff]  ;;  %v135_v9 = vld [vmem:[%s675_s3 + $0x70] sm:$0xff] }
   0x3   :  { %407 = vmatpush3.msra.mxu0 %v43_v0  ;;  %v562_v4 = vld [vmem:[%s672_s0] sm:$0xff]  ;;  %v136_v8 = vld [vmem:[%s675_s3 + $0x78] sm:$0xff]  ;;  %v38_v10 = vld [vmem:[%s674_s2 + $0x50] sm:$0xff] }
   0x4   :  { %408 = vmatprep.subr.mxu0 %v42_v1  ;;  %v22_v5 = vld [vmem:[%s673_s1] sm:$0x7]  ;;  %v571_v7 = vrot.slane %v562_v4, 5  ;;  %441 = vmatprep.subr.mxu1 %v136_v8 }
   0x5   :  { %409 = vmatpush3.msra.mxu0 %v42_v1  ;;  %442 = vmatpush3.msra.mxu1 %v136_v8 }
   0x6   :  { %410 = vmatprep.subr.mxu0 %v41_v2  ;;  %v583_v11 = vsel %vm26_vm0, %v22_v5, %v571_v7 }
   0x7   :  { %411 = vmatpush3.msra.mxu0 %v41_v2 }
   0x8   :  { %412 = vmatprep.subr.mxu0 %v40_v3 }
   0x9   :  { %413 = vmatpush3.msra.mxu0 %v40_v3 }
   0xa   :  { %10 = vsyncpa [#allocation3], 0  ;;  %414 = vmatprep.subr.mxu0 %v39_v6  ;;  %438 = vmatprep.mubr.f32.mxu0 %v583_v11  ;;  %v134_v12 = vld [vmem:[%s675_s3 + $0x68] sm:$0xff]  ;;  %v133_v14 = vld [vmem:[%s675_s3 + $0x60] sm:$0xff]  ;;  %vm212_vm1 = vcmask 31744   ;;  %vm216_vm2 = vcmask 26624   ;;  %v338_v63 = vlaneseq }
   0xb   :  { %415 = vmatpush3.msra.mxu0 %v39_v6  ;;  %v37_v13 = vld [vmem:[%s674_s2 + $0x48] sm:$0xff]  ;;  %443 = vmatprep.subr.mxu1 %v135_v9  ;;  %v36_v15 = vld [vmem:[%s674_s2 + $0x40] sm:$0xff]  ;;  %v132_v16 = vld [vmem:[%s675_s3 + $0x58] sm:$0xff]  ;;  %vm243_vm3 = vcmask 1043456   ;;  %vm326_vm4 = vcmask 1046528   ;;  %vm332_vm5 = vcmask 1045504  }
   0xc   :  { %416 = vmatprep.subr.mxu0 %v38_v10  ;;  %444 = vmatpush3.msra.mxu1 %v135_v9  ;;  %v35_v17 = vld [vmem:[%s674_s2 + $0x38] sm:$0xff]  ;;  %v131_v18 = vld [vmem:[%s675_s3 + $0x50] sm:$0xff]  ;;  %v130_v20 = vld [vmem:[%s675_s3 + $0x48] sm:$0xff]  ;;  %v339_v6 = vshrl.u32 %v338_v63, 7 }
   0xd   :  { %417 = vmatpush3.msra.mxu0 %v38_v10  ;;  %445 = vmatprep.subr.mxu1 %v134_v12  ;;  %v34_v19 = vld [vmem:[%s674_s2 + $0x30] sm:$0xff]  ;;  %v33_v21 = vld [vmem:[%s674_s2 + $0x28] sm:$0xff]  ;;  %v32_v22 = vld [vmem:[%s674_s2 + $0x20] sm:$0xff] }
   0xe   :  { %418 = vmatprep.subr.mxu0 %v37_v13  ;;  %446 = vmatpush3.msra.mxu1 %v134_v12  ;;  %v31_v23 = vld [vmem:[%s674_s2 + $0x18] sm:$0xff]  ;;  %v30_v24 = vld [vmem:[%s674_s2 + $0x10] sm:$0xff]  ;;  %v29_v25 = vld [vmem:[%s674_s2 + $0x8] sm:$0xff]  ;;  %vm341_vm6 = vcmp.lt.s32.totalorder %v339_v6, 3 }
   0xf   :  { %419 = vmatpush3.msra.mxu0 %v37_v13  ;;  %447 = vmatprep.subr.mxu1 %v133_v14  ;;  %v28_v26 = vld [vmem:[%s674_s2] sm:$0xff]  ;;  %v128_v28 = vld [vmem:[%s675_s3 + $0x38] sm:$0xff]  ;;  %v127_v29 = vld [vmem:[%s675_s3 + $0x30] sm:$0xff] }
  0x10   :  { %420 = vmatprep.subr.mxu0 %v36_v15  ;;  %448 = vmatpush3.msra.mxu1 %v133_v14  ;;  %v129_v27 = vld [vmem:[%s675_s3 + $0x40] sm:$0xff]  ;;  %v126_v30 = vld [vmem:[%s675_s3 + $0x28] sm:$0xff]  ;;  %v124_v32 = vld [vmem:[%s675_s3 + $0x18] sm:$0xff] }
  0x11   :  { %421 = vmatpush3.msra.mxu0 %v36_v15  ;;  %449 = vmatprep.subr.mxu1 %v132_v16  ;;  %v125_v31 = vld [vmem:[%s675_s3 + $0x20] sm:$0xff]  ;;  %v123_v33 = vld [vmem:[%s675_s3 + $0x10] sm:$0xff]  ;;  %v122_v34 = vld [vmem:[%s675_s3 + $0x8] sm:$0xff] }
  0x12   :  { %422 = vmatprep.subr.mxu0 %v35_v17  ;;  %450 = vmatpush3.msra.mxu1 %v132_v16  ;;  %v121_v35 = vld [vmem:[%s675_s3] sm:$0xff] }
  0x13   :  { %423 = vmatpush3.msra.mxu0 %v35_v17  ;;  %451 = vmatprep.subr.mxu1 %v131_v18  ;;  %v236_v54 = vld [vmem:[%s676_s4] sm:$0xf]  ;;  %s516_s4 = smov [#allocation2]  }
  0x14   :  { %424 = vmatprep.subr.mxu0 %v34_v19  ;;  %452 = vmatpush3.msra.mxu1 %v131_v18  ;;  %s356_s7 = sshll.u32 %s516_s4, 4  ;;  %s357_s7 = int_to_ptr.vmem [resolvable:$true] %s356_s7 }
  0x15   :  { %425 = vmatpush3.msra.mxu0 %v34_v19  ;;  %453 = vmatprep.subr.mxu1 %v130_v20  ;;  %s494_s8 = scalar_lea.vmem %s357_s7, 128  ;;  %p499_p1 = scmp.lt.s32.totalorder %s357_s7, %s357_s7 }
  0x16   :  { %426 = vmatprep.subr.mxu0 %v33_v21  ;;  %454 = vmatpush3.msra.mxu1 %v130_v20  ;;  %p495_p0 = scmp.ne.s32.totalorder %s357_s7, %s494_s8  ;;  %p500_p2 = scmp.lt.s32.totalorder %s494_s8, %s494_s8 }
  0x17   :  { %427 = vmatpush3.msra.mxu0 %v33_v21  ;;  %455 = vmatprep.subr.mxu1 %v129_v27 }
  0x18   :  { %428 = vmatprep.subr.mxu0 %v32_v22  ;;  %456 = vmatpush3.msra.mxu1 %v129_v27  ;;  %p501_p3 = por %p500_p2, %p499_p1 }
  0x19   :  { %429 = vmatpush3.msra.mxu0 %v32_v22  ;;  %457 = vmatprep.subr.mxu1 %v128_v28 }
  0x1a   :  { %430 = vmatprep.subr.mxu0 %v31_v23  ;;  %458 = vmatpush3.msra.mxu1 %v128_v28  ;;  %p502_p4 = pnand %p501_p3, %p495_p0 }
  0x1b   :  { %431 = vmatpush3.msra.mxu0 %v31_v23  ;;  %459 = vmatprep.subr.mxu1 %v127_v29 }
  0x1c   :  { %432 = vmatprep.subr.mxu0 %v30_v24  ;;  %460 = vmatpush3.msra.mxu1 %v127_v29 }
  0x1d   :  { %433 = vmatpush3.msra.mxu0 %v30_v24  ;;  %461 = vmatprep.subr.mxu1 %v126_v30 }
  0x1e   :  { %434 = vmatprep.subr.mxu0 %v29_v25  ;;  %462 = vmatpush3.msra.mxu1 %v126_v30 }
  0x1f   :  { %435 = vmatpush3.msra.mxu0 %v29_v25  ;;  %463 = vmatprep.subr.mxu1 %v125_v31 }
  0x20   :  { %436 = vmatprep.subr.mxu0 %v28_v26  ;;  %464 = vmatpush3.msra.mxu1 %v125_v31 }
  0x21   :  { %437 = vmatpush3.msra.mxu0 %v28_v26  ;;  %465 = vmatprep.subr.mxu1 %v124_v32 }
  0x22   :  { %439 = vmatmul.mubr.f32.vlgmr.msra.gmra.mxu0 %v571_v7  ;;  %466 = vmatpush3.msra.mxu1 %v124_v32 }
  0x23   :  { %467 = vmatprep.subr.mxu1 %v123_v33  ;;  %476 = vmatprep.subr.msk.mxu0 %vm243_vm3, %v236_v54 }
  0x24   :  { %468 = vmatpush3.msra.mxu1 %v123_v33  ;;  %477 = vmatpush3.msk.msra.mxu0 %vm243_vm3, %v236_v54 }
  0x25   :  { %469 = vmatprep.subr.mxu1 %v122_v34 }
  0x26   :  { %470 = vmatpush3.msra.mxu1 %v122_v34 }
  0x27   :  { %471 = vmatprep.subr.mxu1 %v121_v35 }
  0x28   :  { %472 = vmatpush3.msra.mxu1 %v121_v35 }
  0xe2   :  { %v440_v36 = vpop.f32.mrf.mxu0 }
  0xe4   :  { %v110_v37 = vpop.f32.mrf.mxu0 }
  0xe5   :  { %482 = vtanh.f32 %v110_v37 }
  0xe6   :  { %484 = vtanh.f32 %v440_v36 }
  0xf2   :  { %v483_v38 = vpop.eup %482 }
  0xf3   :  { %v485_v39 = vpop.eup %484  ;;  %473 = vmatprep.mubr.f32.mxu1 %v483_v38 }
  0xf4   :  { %474 = vmatmul.mubr.f32.vlgmr.msra.gmra.mxu1 %v485_v39 }
 0x1b4   :  { %v475_v40 = vpop.f32.mrf.mxu1 }
 0x1b5   :  { %v217_v43 = vsel %vm216_vm2, %v475_v40, -inf }
 0x1b6   :  { %v203_v41 = vpop.f32.mrf.mxu1 }
 0x1b7   :  { %v213_v42 = vsel %vm212_vm1, %v203_v41, -inf }
 0x1b8   :  { %214 = vmax.xlane.f32.xlu0 %v213_v42 }
 0x1bc   :  { %218 = vmax.xlane.f32.xlu0 %v217_v43 }
 0x241   :  { %v215_v44 = vpop.xlane.xlu0 %214 }
 0x242   :  { %v220_v45 = vsub.f32 %v203_v41, %v215_v44 }
 0x244   :  { %v222_v46 = vmul.f32 1.442695, %v220_v45 }
 0x245   :  { %v219_v47 = vpop.xlane.xlu0 %218 }
 0x246   :  { %486 = vpow2.f32 %v222_v46  ;;  %v221_v48 = vsub.f32 %v475_v40, %v219_v47 }
 0x248   :  { %v224_v49 = vmul.f32 1.442695, %v221_v48 }
 0x24a   :  { %488 = vpow2.f32 %v224_v49 }
 0x253   :  { %v487_v50 = vpop.eup %486 }
 0x254   :  { %v226_v51 = vsel %vm212_vm1, %v487_v50, 0.0 }
 0x255   :  { %227 = vadd.xlane.f32.xlu1 %v226_v51 }
 0x257   :  { %v489_v52 = vpop.eup %488 }
 0x258   :  { %v229_v53 = vsel %vm216_vm2, %v489_v52, 0.0 }
 0x259   :  { %230 = vadd.xlane.f32.xlu1 %v229_v53 }
 0x2de   :  { %v228_v55 = vpop.xlane.xlu1 %227 }
 0x2df   :  { %490 = vrcp.f32 %v228_v55 }
 0x2e2   :  { %v231_v56 = vpop.xlane.xlu1 %230 }
 0x2e3   :  { %492 = vrcp.f32 %v231_v56 }
 0x2ec   :  { %v491_v57 = vpop.eup %490 }
 0x2ed   :  { %v233_v58 = vmul.f32 %v491_v57, %v487_v50 }
 0x2ef   :  { %478 = vmatprep.mubr.msk.f32.mxu0 %vm212_vm1, %v233_v58 }
 0x2f0   :  { %v493_v59 = vpop.eup %492 }
 0x2f1   :  { %v235_v60 = vmul.f32 %v493_v59, %v489_v52 }
 0x2f3   :  { %479 = vmatmul.mubr.msk.f32.vlgmr.msra.gmra.mxu0 %vm212_vm1, %v235_v60 }
 0x3b3   :  { %v480_v61 = vpop.f32.mrf.mxu0 }
 0x3b4   :  { %v323_v62 = vmul.f32 %v480_v61, %v571_v7 }
 0x3b5   :  { %v313_v0 = vpop.f32.mrf.mxu0 }
 0x3b6   :  { %v322_v1 = vmul.f32 %v313_v0, %v583_v11  ;;  %v328_v2 = vrot.slane %v323_v62, 1  ;;  %v334_v8 = vrot.slane %v323_v62, 2 }
 0x3b8   :  { %v327_v3 = vrot.slane %v322_v1, 1  ;;  %v333_v5 = vrot.slane %v322_v1, 2 }
 0x3ba   :  { %v329_v9 = vsel %vm326_vm4, %v327_v3, %v328_v2  ;;  %v335_v12 = vsel %vm332_vm5, %v333_v5, %v334_v8 }
 0x3bb   :  { %v331_v10 = vadd.f32 %v329_v9, %v322_v1 }
 0x3bd   :  { %v337_v13 = vadd.f32 %v335_v12, %v331_v10 }
 0x3bf   :  { %v348_v7 = vsel %vm341_vm6, %v562_v4, %v337_v13 }
 0x3c0   :  { %349 = vst [vmem:[#allocation2] sm:$0xff] %v348_v7 }
 0x3c1   :  { %505 = shalt.err (!%p502_p4)
}
 0x3c2   :  { %359 = dma.vmem_to_hbm [thread:$0]  %s357_s7, 128, %s677_s5, [#allocation3]  }
 0x3c3   :  { %514 = dma.done.wait [#allocation3], 128  }
 0x3c4   :  { %515 = vsyncadd [#allocation3], 4294967168 }
 0x3c5   :  { %363 = vsyncpa [#allocation3], 1 }

</bundles_post_ra>
